<compile_context>
chip_gen: v5e
topology: v5e:2x2
jax: 0.10.0
libtpu: 0.0.40
codegen_flags: <defaults>
</compile_context>

<pallas_src>
import functools

import jax
import jax.numpy as jnp
from jax import lax
from jax.experimental import pallas as pl
from jax.experimental.pallas import tpu as pltpu


def _mish(x):
    """Mish(x) = x * tanh(softplus(x)) with a single transcendental.

    With t = exp(x):  tanh(log1p(t)) = t*(t+2) / (t*(t+2) + 2).
    One EUP exp + one approx EUP reciprocal; a single Newton step on the VPU
    restores ~f32 accuracy (approx recip ~12 bit -> ~24 bit after one step).
    x is clamped at 20, where the tanh factor is exactly 1.0 in f32.
    """
    t = jnp.exp(jnp.minimum(x, 20.0))
    u = t * (t + 2.0)
    den = u + 2.0
    r = pl.reciprocal(den, approx=True)
    r = r * (2.0 - den * r)          # one Newton step
    return x * (u * r)


def _inverted_residual_kernel(x_ref, w1_ref, b1_ref, wdm_ref, b2_ref,
                              w3_ref, b3_ref, o_ref, *, img_w, img_hw, use_res):
    """Channels-on-sublanes / spatial-on-lanes; `b_tile` images per grid step.

    x_ref  : (b_tile, Cin, H*W)   input images (NCHW with H,W flattened)
    w1_ref : (hidden, Cin)        expand 1x1 weight (BN scale folded)
    b1_ref : (hidden, 1)          expand bias (conv bias + BN folded)
    wdm_ref: (9, hidden, H*W)     depthwise taps with BN scale AND the static
                                  3x3 boundary mask baked in (zero in halo)
    b2_ref : (hidden, 1)
    w3_ref : (Cout, hidden)       project 1x1 weight (BN scale folded)
    b3_ref : (Cout, 1)
    o_ref  : (b_tile, Cout, H*W)
    """
    b_tile = x_ref.shape[0]
    w1 = w1_ref[...]
    w3 = w3_ref[...]
    b1 = b1_ref[...]
    b2 = b2_ref[...]
    b3 = b3_ref[...]

    for b in range(b_tile):                       # static unroll (b_tile small)
        x = x_ref[b]                              # (Cin, H*W), f32

        # ---- expand 1x1 conv (+ folded BN) + Mish --------------------------
        # Dense (hidden, Cin) @ (Cin, H*W): spatial fills the MXU lane dim.
        h = jnp.dot(w1, x, preferred_element_type=jnp.float32) + b1
        h = _mish(h)                              # (hidden, H*W)

        # ---- depthwise 3x3, stride 1, pad 1 ---------------------------------
        # dy/dx shifts are lane rolls (XLU slot); boundary zero-masks are
        # already baked into the taps, so this loop is roll + mul + add only.
        acc = h * wdm_ref[4]                      # center tap, no roll
        for t in range(9):
            if t == 4:
                continue
            dy = t // 3 - 1
            dx = t % 3 - 1
            off = dy * img_w + dx
            acc = acc + pltpu.roll(h, (-off) % img_hw, axis=1) * wdm_ref[t]
        d = _mish(acc + b2)                       # bias added once

        # ---- project 1x1 conv (+ folded BN), residual -----------------------
        p = jnp.dot(w3, d, preferred_element_type=jnp.float32) + b3
        if use_res:
            p = p + x
        o_ref[b] = p.astype(o_ref.dtype)


def _fold_bn(conv_bias, gamma, beta, mean, var, eps=1e-5):
    """Fold conv bias + BatchNorm (running stats) into per-channel scale/bias."""
    scale = gamma / jnp.sqrt(var + eps)
    bias = (conv_bias - mean) * scale + beta
    return scale, bias


def _pick_b_tile(n):
    """Images per grid step: amortize the ~0.35us fixed per-step overhead while
    keeping >=2 grid steps so both v7x TensorCores get work and the x/out DMAs
    can overlap with compute."""
    if n <= 2:
        return 1
    for bt in (8, 4, 2):
        if n % bt == 0 and n // bt >= 2:
            return bt
    return 1


def inverted_residual_block(x_nchw, params, *, stride=1, b_tile=None):
    """Forward pass matching InvertedResidualBlock (expand_ratio != 1)."""
    assert stride == 1, "stride=1 is required for the residual path in this demo"
    N, Cin, H, W = x_nchw.shape
    HW = H * W
    w1 = params["w1"]                             # (Cin, hidden)
    wd = params["wd"]                             # (3, 3, hidden)
    w3 = params["w3"]                             # (hidden, Cout)
    hidden = w1.shape[1]
    Cout = w3.shape[1]
    use_res = (stride == 1) and (Cin == Cout)

    s1, b1 = _fold_bn(params["b1"], *params["bn1"])
    s2, b2 = _fold_bn(params["bd"], *params["bn2"])
    s3, b3 = _fold_bn(params["b3"], *params["bn3"])

    f32 = jnp.float32
    # Dense per-pixel 1x1 weights (no block-diagonal / W^2 scaling).
    w1t = jnp.transpose(w1 * s1[None, :]).astype(f32)          # (hidden, Cin)
    w3t = jnp.transpose(w3 * s3[None, :]).astype(f32)          # (Cout, hidden)
    b1c = b1.reshape(hidden, 1).astype(f32)
    b2c = b2.reshape(hidden, 1).astype(f32)
    b3c = b3.reshape(Cout, 1).astype(f32)

    # Depthwise taps with the static halo mask baked in (data-independent).
    yy = jnp.arange(HW, dtype=jnp.int32) // W
    xx = jnp.arange(HW, dtype=jnp.int32) % W
    wds = (wd * s2[None, None, :]).reshape(9, hidden)
    taps = []
    for t in range(9):
        dy = t // 3 - 1
        dx = t % 3 - 1
        valid = ((yy + dy >= 0) & (yy + dy < H)
                 & (xx + dx >= 0) & (xx + dx < W)).astype(f32)
        taps.append(wds[t][:, None] * valid[None, :])
    wdm = jnp.stack(taps).astype(f32)                           # (9, hidden, HW)

    # NCHW is already channels-on-sublanes / spatial-on-lanes: pure reshape,
    # no HBM transposes around the pallas_call.
    x = x_nchw.reshape(N, Cin, HW).astype(f32)

    if b_tile is None:
        b_tile = _pick_b_tile(N)
    assert N % b_tile == 0, (N, b_tile)

    kernel = functools.partial(_inverted_residual_kernel,
                               img_w=W, img_hw=HW, use_res=use_res)

    flops = 2 * N * HW * hidden * (Cin + 9 + Cout)
    transcendentals = 4 * N * HW * hidden            # (exp + recip) x 2 Mish
    bytes_accessed = 4 * (x.size + N * Cout * HW + w1t.size + w3t.size
                          + wdm.size + b1c.size + b2c.size + b3c.size)

    # Per-step VMEM: ~8 KiB of activations + ~150 KiB of resident weights
    # (double-buffered ~300 KiB) — far below the scoped limit on every
    # generation, including v7x's 64 MiB physical VMEM.
    out = pl.pallas_call(
        kernel,
        out_shape=jax.ShapeDtypeStruct((N, Cout, HW), jnp.float32),
        grid=(N // b_tile,),
        in_specs=[
            pl.BlockSpec((b_tile, Cin, HW), lambda n: (n, 0, 0)),     # x
            pl.BlockSpec((hidden, Cin), lambda n: (0, 0)),            # w1 (resident)
            pl.BlockSpec((hidden, 1), lambda n: (0, 0)),              # b1
            pl.BlockSpec((9, hidden, HW), lambda n: (0, 0, 0)),       # masked taps
            pl.BlockSpec((hidden, 1), lambda n: (0, 0)),              # b2
            pl.BlockSpec((Cout, hidden), lambda n: (0, 0)),           # w3 (resident)
            pl.BlockSpec((Cout, 1), lambda n: (0, 0)),                # b3
        ],
        out_specs=pl.BlockSpec((b_tile, Cout, HW), lambda n: (n, 0, 0)),
        compiler_params=pltpu.CompilerParams(
            dimension_semantics=("parallel",),       # v7x: 2 TCs split the batch
            vmem_limit_bytes=32 * 1024 * 1024),
        cost_estimate=pl.CostEstimate(
            flops=flops, transcendentals=transcendentals,
            bytes_accessed=bytes_accessed),
    )(x, w1t, b1c, wdm, b2c, w3t, b3c)

    return out.reshape(N, Cout, H, W)


# ---------------------------------------------------------------------------
# Pure-JAX reference (inference-mode BN) and parameter construction.
# ---------------------------------------------------------------------------

def _mish_ref(x):
    return x * jnp.tanh(jax.nn.softplus(x))


def _reference(x_nchw, params, *, stride=1):
    """Pure-JAX reference using lax.conv (inference-mode BN)."""
    x = jnp.transpose(x_nchw, (0, 2, 3, 1))
    Cin = x.shape[-1]
    hidden = params["w1"].shape[1]
    Cout = params["w3"].shape[1]
    dn = ("NHWC", "HWIO", "NHWC")

    s1, b1 = _fold_bn(params["b1"], *params["bn1"])
    s2, b2 = _fold_bn(params["bd"], *params["bn2"])
    s3, b3 = _fold_bn(params["b3"], *params["bn3"])

    h = lax.conv_general_dilated(x, params["w1"].reshape(1, 1, Cin, hidden),
                                 (1, 1), "VALID", dimension_numbers=dn)
    h = _mish_ref(h * s1 + b1)
    d = lax.conv_general_dilated(h, params["wd"].reshape(3, 3, 1, hidden),
                                 (stride, stride), ((1, 1), (1, 1)),
                                 dimension_numbers=dn, feature_group_count=hidden)
    d = _mish_ref(d * s2 + b2)
    p = lax.conv_general_dilated(d, params["w3"].reshape(1, 1, hidden, Cout),
                                 (1, 1), "VALID", dimension_numbers=dn)
    p = p * s3 + b3
    if stride == 1 and Cin == Cout:
        p = p + x
    return jnp.transpose(p, (0, 3, 1, 2))


def make_params(key, in_channels, out_channels, expand_ratio):
    hidden = in_channels * expand_ratio
    ks = jax.random.split(key, 16)

    def bn(k, c):
        k0, k1, k2, k3 = jax.random.split(k, 4)
        gamma = 1.0 + 0.1 * jax.random.normal(k0, (c,), jnp.float32)
        beta = 0.1 * jax.random.normal(k1, (c,), jnp.float32)
        mean = 0.1 * jax.random.normal(k2, (c,), jnp.float32)
        var = jax.random.uniform(k3, (c,), jnp.float32, 0.5, 1.5)
        return gamma, beta, mean, var

    return {
        # expand 1x1: PyTorch (hidden, Cin, 1, 1) -> stored as (Cin, hidden)
        "w1": 0.2 * jax.random.normal(ks[0], (in_channels, hidden), jnp.float32),
        "b1": 0.1 * jax.random.normal(ks[1], (hidden,), jnp.float32),
        "bn1": bn(ks[2], hidden),
        # depthwise 3x3: PyTorch (hidden, 1, 3, 3) -> stored as (3, 3, hidden)
        "wd": 0.2 * jax.random.normal(ks[3], (3, 3, hidden), jnp.float32),
        "bd": 0.1 * jax.random.normal(ks[4], (hidden,), jnp.float32),
        "bn2": bn(ks[5], hidden),
        # project 1x1: PyTorch (Cout, hidden, 1, 1) -> stored as (hidden, Cout)
        "w3": 0.2 * jax.random.normal(ks[6], (hidden, out_channels), jnp.float32),
        "b3": 0.1 * jax.random.normal(ks[7], (out_channels,), jnp.float32),
        "bn3": bn(ks[8], out_channels),
    }


if __name__ == "__main__":
    key = jax.random.PRNGKey(0)
    kx, kp = jax.random.split(key)

    # InvertedResidualBlock(in_channels=4, out_channels=4, expand_ratio=4, stride=1)
    in_channels, out_channels, expand_ratio, stride = 4, 4, 4, 1
    x = jax.random.normal(kx, (2, in_channels, 16, 16), jnp.float32)  # NCHW
    params = make_params(kp, in_channels, out_channels, expand_ratio)

    out = inverted_residual_block(x, params, stride=stride)
    out = jax.block_until_ready(out)

    ref = _reference(x, params, stride=stride)
    assert out.shape == ref.shape == (2, out_channels, 16, 16)
    assert jnp.allclose(out, ref, atol=2e-4, rtol=2e-4), (
        float(jnp.max(jnp.abs(out - ref))))

    print("KERNEL_OK")
</pallas_src>

<mosaic_0001>
module attributes {stable_mosaic.version = 11 : i64} {
  func.func @_inverted_residual_kernel(%arg0: i32, %arg1: memref<1x4x256xf32, #tpu.memory_space<vmem>>, %arg2: memref<16x4xf32, #tpu.memory_space<vmem>>, %arg3: memref<16x1xf32, #tpu.memory_space<vmem>>, %arg4: memref<9x16x256xf32, #tpu.memory_space<vmem>>, %arg5: memref<16x1xf32, #tpu.memory_space<vmem>>, %arg6: memref<4x16xf32, #tpu.memory_space<vmem>>, %arg7: memref<4x1xf32, #tpu.memory_space<vmem>>, %arg8: memref<1x4x256xf32, #tpu.memory_space<vmem>>) attributes {dimension_semantics = [#tpu.dimension_semantics<parallel>], iteration_bounds = array<i64: 2>, scalar_prefetch = 0 : i64, scratch_operands = 0 : i64, tpu.core_type = #tpu.core_type<tc>, window_params = [{transform_indices = @transform_0, window_bounds = array<i64: 1, 4, 256>}, {pipeline_mode = #tpu.pipeline_mode<synchronous>, transform_indices = @transform_1, window_bounds = array<i64: 16, 4>}, {pipeline_mode = #tpu.pipeline_mode<synchronous>, transform_indices = @transform_2, window_bounds = array<i64: 16, 1>}, {pipeline_mode = #tpu.pipeline_mode<synchronous>, transform_indices = @transform_3, window_bounds = array<i64: 9, 16, 256>}, {pipeline_mode = #tpu.pipeline_mode<synchronous>, transform_indices = @transform_4, window_bounds = array<i64: 16, 1>}, {pipeline_mode = #tpu.pipeline_mode<synchronous>, transform_indices = @transform_5, window_bounds = array<i64: 4, 16>}, {pipeline_mode = #tpu.pipeline_mode<synchronous>, transform_indices = @transform_6, window_bounds = array<i64: 4, 1>}, {transform_indices = @transform_7, window_bounds = array<i64: 1, 4, 256>}]} {
    %c0 = arith.constant 0 : index
    %c0_0 = arith.constant 0 : index
    %0 = vector.load %arg2[%c0, %c0_0] : memref<16x4xf32, #tpu.memory_space<vmem>>, vector<16x4xf32>
    %c0_1 = arith.constant 0 : index
    %c0_2 = arith.constant 0 : index
    %1 = vector.load %arg6[%c0_1, %c0_2] : memref<4x16xf32, #tpu.memory_space<vmem>>, vector<4x16xf32>
    %c0_3 = arith.constant 0 : index
    %c0_4 = arith.constant 0 : index
    %2 = vector.load %arg3[%c0_3, %c0_4] : memref<16x1xf32, #tpu.memory_space<vmem>>, vector<16x1xf32>
    %c0_5 = arith.constant 0 : index
    %c0_6 = arith.constant 0 : index
    %3 = vector.load %arg5[%c0_5, %c0_6] : memref<16x1xf32, #tpu.memory_space<vmem>>, vector<16x1xf32>
    %c0_7 = arith.constant 0 : index
    %c0_8 = arith.constant 0 : index
    %4 = vector.load %arg7[%c0_7, %c0_8] : memref<4x1xf32, #tpu.memory_space<vmem>>, vector<4x1xf32>
    %c0_9 = arith.constant 0 : index
    %c0_10 = arith.constant 0 : index
    %c0_11 = arith.constant 0 : index
    %5 = vector.load %arg1[%c0_9, %c0_10, %c0_11] : memref<1x4x256xf32, #tpu.memory_space<vmem>>, vector<1x4x256xf32>
    %6 = vector.shape_cast %5 : vector<1x4x256xf32> to vector<4x256xf32>
    %cst = arith.constant dense<0.000000e+00> : vector<16x256xf32>
    %7 = tpu.matmul %0, %6, %cst {dimension_numbers = #tpu.dot_dimension_numbers<[1], [0], [0], [1], [0, 0, 1, 1], [], []>} : vector<16x4xf32>, vector<4x256xf32>, vector<16x256xf32> -> vector<16x256xf32>
    %8 = vector.broadcast %2 : vector<16x1xf32> to vector<16x256xf32>
    %9 = arith.addf %7, %8 : vector<16x256xf32>
    %cst_12 = arith.constant 2.000000e+01 : f32
    %10 = vector.broadcast %cst_12 : f32 to vector<16x256xf32>
    %11 = arith.minimumf %9, %10 : vector<16x256xf32>
    %12 = math.exp %11 : vector<16x256xf32>
    %cst_13 = arith.constant 2.000000e+00 : f32
    %13 = vector.broadcast %cst_13 : f32 to vector<16x256xf32>
    %14 = arith.addf %12, %13 : vector<16x256xf32>
    %15 = arith.mulf %12, %14 : vector<16x256xf32>
    %cst_14 = arith.constant 2.000000e+00 : f32
    %16 = vector.broadcast %cst_14 : f32 to vector<16x256xf32>
    %17 = arith.addf %15, %16 : vector<16x256xf32>
    %18 = tpu.reciprocal %17 {approx = true} : vector<16x256xf32> -> vector<16x256xf32>
    %19 = arith.mulf %17, %18 : vector<16x256xf32>
    %cst_15 = arith.constant 2.000000e+00 : f32
    %20 = vector.broadcast %cst_15 : f32 to vector<16x256xf32>
    %21 = arith.subf %20, %19 : vector<16x256xf32>
    %22 = arith.mulf %18, %21 : vector<16x256xf32>
    %23 = arith.mulf %15, %22 : vector<16x256xf32>
    %24 = arith.mulf %9, %23 : vector<16x256xf32>
    %c4 = arith.constant 4 : index
    %c0_16 = arith.constant 0 : index
    %c0_17 = arith.constant 0 : index
    %25 = vector.load %arg4[%c4, %c0_16, %c0_17] : memref<9x16x256xf32, #tpu.memory_space<vmem>>, vector<1x16x256xf32>
    %26 = vector.shape_cast %25 : vector<1x16x256xf32> to vector<16x256xf32>
    %27 = arith.mulf %24, %26 : vector<16x256xf32>
    %c17_i32 = arith.constant 17 : i32
    %28 = tpu.dynamic_rotate %24 by %c17_i32 dim 1 : vector<16x256xf32>, i32 -> vector<16x256xf32>
    %c0_18 = arith.constant 0 : index
    %c0_19 = arith.constant 0 : index
    %c0_20 = arith.constant 0 : index
    %29 = vector.load %arg4[%c0_18, %c0_19, %c0_20] : memref<9x16x256xf32, #tpu.memory_space<vmem>>, vector<1x16x256xf32>
    %30 = vector.shape_cast %29 : vector<1x16x256xf32> to vector<16x256xf32>
    %31 = arith.mulf %28, %30 : vector<16x256xf32>
    %32 = arith.addf %27, %31 : vector<16x256xf32>
    %c16_i32 = arith.constant 16 : i32
    %33 = tpu.dynamic_rotate %24 by %c16_i32 dim 1 : vector<16x256xf32>, i32 -> vector<16x256xf32>
    %c1 = arith.constant 1 : index
    %c0_21 = arith.constant 0 : index
    %c0_22 = arith.constant 0 : index
    %34 = vector.load %arg4[%c1, %c0_21, %c0_22] : memref<9x16x256xf32, #tpu.memory_space<vmem>>, vector<1x16x256xf32>
    %35 = vector.shape_cast %34 : vector<1x16x256xf32> to vector<16x256xf32>
    %36 = arith.mulf %33, %35 : vector<16x256xf32>
    %37 = arith.addf %32, %36 : vector<16x256xf32>
    %c15_i32 = arith.constant 15 : i32
    %38 = tpu.dynamic_rotate %24 by %c15_i32 dim 1 : vector<16x256xf32>, i32 -> vector<16x256xf32>
    %c2 = arith.constant 2 : index
    %c0_23 = arith.constant 0 : index
    %c0_24 = arith.constant 0 : index
    %39 = vector.load %arg4[%c2, %c0_23, %c0_24] : memref<9x16x256xf32, #tpu.memory_space<vmem>>, vector<1x16x256xf32>
    %40 = vector.shape_cast %39 : vector<1x16x256xf32> to vector<16x256xf32>
    %41 = arith.mulf %38, %40 : vector<16x256xf32>
    %42 = arith.addf %37, %41 : vector<16x256xf32>
    %c1_i32 = arith.constant 1 : i32
    %43 = tpu.dynamic_rotate %24 by %c1_i32 dim 1 : vector<16x256xf32>, i32 -> vector<16x256xf32>
    %c3 = arith.constant 3 : index
    %c0_25 = arith.constant 0 : index
    %c0_26 = arith.constant 0 : index
    %44 = vector.load %arg4[%c3, %c0_25, %c0_26] : memref<9x16x256xf32, #tpu.memory_space<vmem>>, vector<1x16x256xf32>
    %45 = vector.shape_cast %44 : vector<1x16x256xf32> to vector<16x256xf32>
    %46 = arith.mulf %43, %45 : vector<16x256xf32>
    %47 = arith.addf %42, %46 : vector<16x256xf32>
    %c255_i32 = arith.constant 255 : i32
    %48 = tpu.dynamic_rotate %24 by %c255_i32 dim 1 : vector<16x256xf32>, i32 -> vector<16x256xf32>
    %c5 = arith.constant 5 : index
    %c0_27 = arith.constant 0 : index
    %c0_28 = arith.constant 0 : index
    %49 = vector.load %arg4[%c5, %c0_27, %c0_28] : memref<9x16x256xf32, #tpu.memory_space<vmem>>, vector<1x16x256xf32>
    %50 = vector.shape_cast %49 : vector<1x16x256xf32> to vector<16x256xf32>
    %51 = arith.mulf %48, %50 : vector<16x256xf32>
    %52 = arith.addf %47, %51 : vector<16x256xf32>
    %c241_i32 = arith.constant 241 : i32
    %53 = tpu.dynamic_rotate %24 by %c241_i32 dim 1 : vector<16x256xf32>, i32 -> vector<16x256xf32>
    %c6 = arith.constant 6 : index
    %c0_29 = arith.constant 0 : index
    %c0_30 = arith.constant 0 : index
    %54 = vector.load %arg4[%c6, %c0_29, %c0_30] : memref<9x16x256xf32, #tpu.memory_space<vmem>>, vector<1x16x256xf32>
    %55 = vector.shape_cast %54 : vector<1x16x256xf32> to vector<16x256xf32>
    %56 = arith.mulf %53, %55 : vector<16x256xf32>
    %57 = arith.addf %52, %56 : vector<16x256xf32>
    %c240_i32 = arith.constant 240 : i32
    %58 = tpu.dynamic_rotate %24 by %c240_i32 dim 1 : vector<16x256xf32>, i32 -> vector<16x256xf32>
    %c7 = arith.constant 7 : index
    %c0_31 = arith.constant 0 : index
    %c0_32 = arith.constant 0 : index
    %59 = vector.load %arg4[%c7, %c0_31, %c0_32] : memref<9x16x256xf32, #tpu.memory_space<vmem>>, vector<1x16x256xf32>
    %60 = vector.shape_cast %59 : vector<1x16x256xf32> to vector<16x256xf32>
    %61 = arith.mulf %58, %60 : vector<16x256xf32>
    %62 = arith.addf %57, %61 : vector<16x256xf32>
    %c239_i32 = arith.constant 239 : i32
    %63 = tpu.dynamic_rotate %24 by %c239_i32 dim 1 : vector<16x256xf32>, i32 -> vector<16x256xf32>
    %c8 = arith.constant 8 : index
    %c0_33 = arith.constant 0 : index
    %c0_34 = arith.constant 0 : index
    %64 = vector.load %arg4[%c8, %c0_33, %c0_34] : memref<9x16x256xf32, #tpu.memory_space<vmem>>, vector<1x16x256xf32>
    %65 = vector.shape_cast %64 : vector<1x16x256xf32> to vector<16x256xf32>
    %66 = arith.mulf %63, %65 : vector<16x256xf32>
    %67 = arith.addf %62, %66 : vector<16x256xf32>
    %68 = vector.broadcast %3 : vector<16x1xf32> to vector<16x256xf32>
    %69 = arith.addf %67, %68 : vector<16x256xf32>
    %cst_35 = arith.constant 2.000000e+01 : f32
    %70 = vector.broadcast %cst_35 : f32 to vector<16x256xf32>
    %71 = arith.minimumf %69, %70 : vector<16x256xf32>
    %72 = math.exp %71 : vector<16x256xf32>
    %cst_36 = arith.constant 2.000000e+00 : f32
    %73 = vector.broadcast %cst_36 : f32 to vector<16x256xf32>
    %74 = arith.addf %72, %73 : vector<16x256xf32>
    %75 = arith.mulf %72, %74 : vector<16x256xf32>
    %cst_37 = arith.constant 2.000000e+00 : f32
    %76 = vector.broadcast %cst_37 : f32 to vector<16x256xf32>
    %77 = arith.addf %75, %76 : vector<16x256xf32>
    %78 = tpu.reciprocal %77 {approx = true} : vector<16x256xf32> -> vector<16x256xf32>
    %79 = arith.mulf %77, %78 : vector<16x256xf32>
    %cst_38 = arith.constant 2.000000e+00 : f32
    %80 = vector.broadcast %cst_38 : f32 to vector<16x256xf32>
    %81 = arith.subf %80, %79 : vector<16x256xf32>
    %82 = arith.mulf %78, %81 : vector<16x256xf32>
    %83 = arith.mulf %75, %82 : vector<16x256xf32>
    %84 = arith.mulf %69, %83 : vector<16x256xf32>
    %cst_39 = arith.constant dense<0.000000e+00> : vector<4x256xf32>
    %85 = tpu.matmul %1, %84, %cst_39 {dimension_numbers = #tpu.dot_dimension_numbers<[1], [0], [0], [1], [0, 0, 1, 1], [], []>} : vector<4x16xf32>, vector<16x256xf32>, vector<4x256xf32> -> vector<4x256xf32>
    %86 = vector.broadcast %4 : vector<4x1xf32> to vector<4x256xf32>
    %87 = arith.addf %85, %86 : vector<4x256xf32>
    %88 = arith.addf %87, %6 : vector<4x256xf32>
    %c0_40 = arith.constant 0 : index
    %c0_41 = arith.constant 0 : index
    %c0_42 = arith.constant 0 : index
    %89 = vector.load %arg8[%c0_40, %c0_41, %c0_42] : memref<1x4x256xf32, #tpu.memory_space<vmem>>, vector<1x4x256xf32>
    %90 = vector.shape_cast %89 : vector<1x4x256xf32> to vector<4x256xf32>
    %91 = vector.shape_cast %88 : vector<4x256xf32> to vector<1x4x256xf32>
    tpu.vector_store %arg8[%c0_40, %c0_41, %c0_42], %91 {strides = array<i32>} : memref<1x4x256xf32, #tpu.memory_space<vmem>>, vector<1x4x256xf32>,
    return
  }
  func.func @transform_0(%arg0: i32) -> (i32, i32, i32) {
    %c0_i32 = arith.constant 0 : i32
    %c0_i32_0 = arith.constant 0 : i32
    %c0_i32_1 = arith.constant 0 : i32
    return %arg0, %c0_i32, %c0_i32_0 : i32, i32, i32
  }
  func.func @transform_1(%arg0: i32) -> (i32, i32) {
    %c0_i32 = arith.constant 0 : i32
    %c0_i32_0 = arith.constant 0 : i32
    %c0_i32_1 = arith.constant 0 : i32
    return %c0_i32, %c0_i32_0 : i32, i32
  }
  func.func @transform_2(%arg0: i32) -> (i32, i32) {
    %c0_i32 = arith.constant 0 : i32
    %c0_i32_0 = arith.constant 0 : i32
    %c0_i32_1 = arith.constant 0 : i32
    return %c0_i32, %c0_i32_0 : i32, i32
  }
  func.func @transform_3(%arg0: i32) -> (i32, i32, i32) {
    %c0_i32 = arith.constant 0 : i32
    %c0_i32_0 = arith.constant 0 : i32
    %c0_i32_1 = arith.constant 0 : i32
    %c0_i32_2 = arith.constant 0 : i32
    return %c0_i32, %c0_i32_0, %c0_i32_1 : i32, i32, i32
  }
  func.func @transform_4(%arg0: i32) -> (i32, i32) {
    %c0_i32 = arith.constant 0 : i32
    %c0_i32_0 = arith.constant 0 : i32
    %c0_i32_1 = arith.constant 0 : i32
    return %c0_i32, %c0_i32_0 : i32, i32
  }
  func.func @transform_5(%arg0: i32) -> (i32, i32) {
    %c0_i32 = arith.constant 0 : i32
    %c0_i32_0 = arith.constant 0 : i32
    %c0_i32_1 = arith.constant 0 : i32
    return %c0_i32, %c0_i32_0 : i32, i32
  }
  func.func @transform_6(%arg0: i32) -> (i32, i32) {
    %c0_i32 = arith.constant 0 : i32
    %c0_i32_0 = arith.constant 0 : i32
    %c0_i32_1 = arith.constant 0 : i32
    return %c0_i32, %c0_i32_0 : i32, i32
  }
  func.func @transform_7(%arg0: i32) -> (i32, i32, i32) {
    %c0_i32 = arith.constant 0 : i32
    %c0_i32_0 = arith.constant 0 : i32
    %c0_i32_1 = arith.constant 0 : i32
    return %arg0, %c0_i32, %c0_i32_0 : i32, i32, i32
  }
}

</mosaic_0001>

<bundles_post_ra>
// kernel: tpu_custom_call.1
= control target key start
LH: loop header
LB: loop body
LE: loop exit
PB: predicated region body
PF: predicated region fallthrough
CT: control target
= control target key end

     0   :  { %12 = vsyncpa [#allocation3], 0  ;;  %s1415_s0 = inlined_call_operand.vmem [shape: f32[2,4,256], index: 0, kind: input, shape index: {}]   ;;  %s1416_s1 = inlined_call_operand.vmem [shape: f32[16,4], index: 1, kind: input, shape index: {}]   ;;  %s1417_s2 = inlined_call_operand.vmem [shape: f32[16,1], index: 2, kind: input, shape index: {}]   ;;  %s1418_s3 = inlined_call_operand.hbm [shape: f32[9,16,256], index: 3, kind: input, shape index: {}]   ;;  %s1419_s4 = inlined_call_operand.vmem [shape: f32[16,1], index: 4, kind: input, shape index: {}]   ;;  %s1420_s5 = inlined_call_operand.vmem [shape: f32[4,16], index: 5, kind: input, shape index: {}]   ;;  %s1421_s6 = inlined_call_operand.vmem [shape: f32[4,1], index: 6, kind: input, shape index: {}]   ;;  %s1422_s7 = inlined_call_operand.hbm [shape: f32[2,4,256], index: 7, kind: output, shape index: {}]  }
   0x1   :  { %13 = vsyncpa [#allocation4], 0 }
   0x2   :  { %15 = vsyncpa [#allocation4 + $0x1], 0  ;;  %s1123_s24 = smov 0   ;;  %s1125_s25 = smov 0  }
   0x3   :  { %s1127_s26 = smov 0   ;;  %s1129_s27 = smov 0  }
   0x4 LB: > { %s1144_s28 = sadd.s32 4294967295, %s1069_s27   ;;  %s853_s29 = sadd.s32 4294967294, %s1069_s27   ;;  %s1069_s27 = sphi %s1129_s27, %s1428_s27   ;;  %s1065_s26 = sphi %s1127_s26, %s1427_s26   ;;  %s1061_s25 = sphi %s1125_s25, %s1426_s25   ;;  %s1057_s24 = sphi %s1123_s24, %s1425_s24  }
   0x5   : > { %s1148_s30 = sadd.s32 1, %s1069_s27   ;;  %s180_s8 = sadd.s32 1, %s1065_s26 }
   0x6   : > { %s177_s9 = ssub.s32 %s1069_s27, %s1148_s30  ;;  %p190_p0 = scmp.ne.s32.totalorder %s1065_s26, %s1061_s25 }
   0x7   : > { %p178_p1 = scmp.eq.s32.totalorder %s177_s9, 0  ;;  %p191_p2 = scmp.eq.s32.totalorder %s1144_s28, 1 }
   0x8   : > { %p196_p3 = scmp.ne.s32.totalorder %s1061_s25, %s1057_s24  ;;  %p197_p4 = scmp.eq.s32.totalorder %s853_s29, 1 }
   0x9   : > { %s1159_s10 = scalar_select %p178_p1, %s1065_s26, %s180_s8  }
   0xa   : > { %p1161_p5 = por %p191_p2, %p190_p0  ;;  %p1165_p6 = por %p197_p4, %p196_p3 }
   0xb   : > { %p854_p7 = scmp.ge.s32.totalorder %s1069_s27, 1  ;;  %p204_p8 = scmp.lt.s32.totalorder %s1069_s27, 3 }
   0xc   : > { %p891_p9 = scmp.eq.s32.totalorder %s1144_s28, 0  ;;  %s221_s15 = sshll.u32 %s1418_s3, 4  ;;  %s222_s15 = int_to_ptr.hbm [resolvable:$true] %s221_s15 }
   0xd   : > { %p205_p10 = pnand %p854_p7, %p204_p8  ;;  %s1071_s16 = smov [#allocation2]  }
   0xe   : > { %s223_s17 = sshll.u32 %s1071_s16, 4  ;;  %s1072_s18 = smov 256   ;;  %s224_s17 = int_to_ptr.vmem [resolvable:$true] %s223_s17 }
   0xf   : > { %p883_p11 = pneg %p205_p10  ;;  %s1073_s19 = smov 16  }
  0x10   : > { %256 = sbr.rel (%p205_p10) target bundleno = 586 (0x24a), region = 48 }
  0x11   : > { %p884_p12 = pnand %p891_p9, %p883_p11 }
  0x13   : > { %886 = dma.hbm_to_vmem [thread:$0]  (!%p884_p12), %s222_s15, 4608, %s224_s17, [#allocation3], %s1072_s18, %s1072_s18, %s1073_s19  }
  0x15   : > { %1048 = dma.done.wait (%p891_p9), [#allocation3], 4608  }
  0x16   : > { %1050 = vsyncadd (%p891_p9), [#allocation3], 4294962688  ;;  %p289_p13 = scmp.lt.s32.totalorder %s1144_s28, 1  ;;  %v1074_v0 = vmov 0   ;;  %v298_v1 = vld [vmem:[%s1417_s2 + $0x8] sm:$0xff]  ;;  %vm324_vm0 = vcmask 1043456  }
  0x17   : > { %938 = vset.pattern.permute.xlu0 %v1074_v0  ;;  %939 = vset.pattern.permute.xlu1 %v1074_v0  ;;  %v294_v3 = vld [vmem:[%s1416_s1] sm:$0xff]  ;;  %vm317_vm1 = vcmask 31744   ;;  %v295_v7 = vld [vmem:[%s1416_s1 + $0x8] sm:$0xff]  ;;  %s1075_s19 = smov 17   ;;  %s1078_s22 = smov 1   ;;  %vm708_vm10 = vcmask 130048  }
  0x18   : > { %s290_s20 = scalar_select %p289_p13, %s1144_s28, 1  ;;  %940 = vset.pattern.permute.xlu2 %v1074_v0  ;;  %310 = vperm.xlu0 %938, %v298_v1   ;;  %v297_v4 = vld [vmem:[%s1417_s2] sm:$0xff] }
  0x19   : > { %s1079_s23 = smov 113   ;;  %s1081_s8 = smov 112  }
  0x1a   : > { %s875_s21 = sshll.u32 %s290_s20, 3  ;;  %s1076_s20 = smov 15  }
  0x1b   : > { %s293_s29 = scalar_lea.vmem %s1415_s0, %s875_s21  ;;  %s1077_s21 = smov 16  }
  0x1c   : > { %v302_v2 = vld [vmem:[%s293_s29] sm:$0xff]  ;;  %s1080_s29 = smov 127   ;;  %s1082_s9 = smov 111  }
  0x1d   : > { %314 = vst [vmem:[#allocation1] ss:$2 sm:$0xff] %v302_v2 }
  0x20   : > { %305 = vperm.xlu0 %938, %v297_v4   ;;  %v300_v4 = vld [vmem:[%s1419_s4 + $0x8] sm:$0xff] }
  0x24   : > { %v315_v5 = vld.sshfl [vmem:[#allocation1] sm:$0xff pattern:$0x75316420]  ;;  %v316_v6 = vld.sshfl [vmem:[#allocation1 + $0x8] sm:$0xff pattern:$0x75316420] }
  0x25   : > { %862 = vmatpush.msk.msra.mxu0 %vm324_vm0, %v315_v5  ;;  %865 = vmatpush.msk.msra.mxu1 %vm324_vm0, %v316_v6  ;;  %752 = vst [vmem:[#allocation1] ss:$2 sm:$0xff] %v302_v2  ;;  %v301_v2 = vld [vmem:[%s1421_s6] sm:$0xf] }
  0x26   : > { %863 = vmatmul.msk.f32.vlgmr.msra.gmra.mxu0 %vm317_vm1, %v294_v3  ;;  %866 = vmatmul.msk.f32.vlgmr.msra.gmra.mxu1 %vm317_vm1, %v294_v3  ;;  %v299_v3 = vld [vmem:[%s1419_s4] sm:$0xff] }
  0x2e   : > { %864 = vmatmul.msk.f32.gmra.mxu0 %vm317_vm1, %v295_v7  ;;  %867 = vmatmul.msk.f32.gmra.mxu1 %vm317_vm1, %v295_v7  ;;  %v440_v7 = vlaneseq }
  0x8a   : > { %v311_v8 = vpop.permute.xlu0 %310 }
  0x92   : > { %v306_v9 = vpop.permute.xlu0 %305 }
  0xa3   : > { %v346_v10 = vpop.f32.mrf.mxu0  ;;  %v369_v11 = vpop.f32.mrf.mxu1 }
  0xa4   : > { %v347_v12 = vadd.f32 %v346_v10, %v306_v9  ;;  %v370_v13 = vadd.f32 %v369_v11, %v306_v9  ;;  %v1277_v9 = vand.u32 127, %v440_v7 }
  0xa6   : > { %v375_v14 = vmin.f32 %v347_v12, 20.0  ;;  %v376_v15 = vmin.f32 %v370_v13, 20.0  ;;  %vm442_vm2 = vcmp.lt.s32.totalorder %v1277_v9, 17  ;;  %vm467_vm3 = vcmp.lt.s32.totalorder %v1277_v9, 16 }
  0xa7   : > { %vm519_vm4 = vcmp.lt.s32.totalorder %v1277_v9, 1  ;;  %vm493_vm5 = vcmp.lt.s32.totalorder %v1277_v9, 15  ;;  %vm545_vm6 = vcmp.lt.s32.totalorder %v1277_v9, 127  ;;  %vm571_vm7 = vcmp.lt.s32.totalorder %v1277_v9, 113 }
  0xa8   : > { %v379_v16 = vmul.f32 1.442695, %v375_v14  ;;  %v381_v17 = vmul.f32 1.442695, %v376_v15  ;;  %v448_v14 = vld [vmem:[#allocation2 + $0x8] sm:$0xff]  ;;  %vm597_vm8 = vcmp.lt.s32.totalorder %v1277_v9, 112 }
  0xa9   : > { %vm623_vm9 = vcmp.lt.s32.totalorder %v1277_v9, 111 }
  0xaa   : > { %941 = vpow2.f32 %v379_v16 }
  0xab   : > { %943 = vpow2.f32 %v381_v17  ;;  %v349_v18 = vpop.f32.mrf.mxu0  ;;  %v372_v25 = vpop.f32.mrf.mxu1  ;;  %v424_v17 = vld [vmem:[#allocation2 + $0x80] sm:$0xff] }
  0xac   : > { %v1200_v19 = vadd.f32 %v349_v18, %v311_v8  ;;  %v1203_v30 = vadd.f32 %v372_v25, %v311_v8  ;;  %v425_v18 = vld [vmem:[#allocation2 + $0x88] sm:$0xff] }
  0xae   : > { %v377_v23 = vmin.f32 %v1200_v19, 20.0  ;;  %v378_v32 = vmin.f32 %v1203_v30, 20.0 }
  0xb0   : > { %v942_v20 = vpop.eup %941  ;;  %v383_v29 = vmul.f32 1.442695, %v377_v23  ;;  %v385_v34 = vmul.f32 1.442695, %v378_v32 }
  0xb1   : > { %v944_v21 = vpop.eup %943  ;;  %v387_v22 = vadd.f32 2.0, %v942_v20 }
  0xb2   : > { %v388_v24 = vadd.f32 2.0, %v944_v21 }
  0xb3   : > { %v391_v26 = vmul.f32 %v942_v20, %v387_v22  ;;  %v474_v20 = vld [vmem:[#allocation2 + $0x28] sm:$0xff] }
  0xb4   : > { %v392_v27 = vmul.f32 %v944_v21, %v388_v24 }
  0xb5   : > { %v395_v28 = vadd.f32 2.0, %v391_v26 }
  0xb6   : > { %v396_v31 = vadd.f32 2.0, %v392_v27 }
  0xb7   : > { %945 = vrcp.f32 %v395_v28 }
  0xb8   : > { %947 = vrcp.f32 %v396_v31 }
  0xb9   : > { %949 = vpow2.f32 %v383_v29  ;;  %v499_v29 = vld [vmem:[#allocation2 + $0x40] sm:$0xff] }
  0xba   : > { %951 = vpow2.f32 %v385_v34 }
  0xbd   : > { %v946_v33 = vpop.eup %945 }
  0xbe   : > { %v948_v35 = vpop.eup %947  ;;  %v403_v36 = vmul.f32 %v946_v33, %v395_v28 }
  0xbf   : > { %v950_v37 = vpop.eup %949  ;;  %v404_v38 = vmul.f32 %v948_v35, %v396_v31 }
  0xc0   : > { %v407_v39 = vsub.f32 2.0, %v403_v36  ;;  %v389_v42 = vadd.f32 2.0, %v950_v37  ;;  %v952_v48 = vpop.eup %951  ;;  %v525_v36 = vld [vmem:[#allocation2 + $0x60] sm:$0xff] }
  0xc1   : > { %v408_v40 = vsub.f32 2.0, %v404_v38  ;;  %v390_v51 = vadd.f32 2.0, %v952_v48 }
  0xc2   : > { %v411_v41 = vmul.f32 %v946_v33, %v407_v39  ;;  %v393_v47 = vmul.f32 %v950_v37, %v389_v42  ;;  %v526_v37 = vld [vmem:[#allocation2 + $0x68] sm:$0xff] }
  0xc3   : > { %v412_v43 = vmul.f32 %v948_v35, %v408_v40  ;;  %v394_v52 = vmul.f32 %v952_v48, %v390_v51 }
  0xc4   : > { %v415_v44 = vmul.f32 %v411_v41, %v391_v26  ;;  %v397_v50 = vadd.f32 2.0, %v393_v47 }
  0xc5   : > { %v416_v45 = vmul.f32 %v412_v43, %v392_v27  ;;  %v398_v53 = vadd.f32 2.0, %v394_v52 }
  0xc6   : > { %v1206_v46 = vmul.f32 %v415_v44, %v347_v12  ;;  %953 = vrcp.f32 %v397_v50 }
  0xc7   : > { %v1208_v49 = vmul.f32 %v416_v45, %v370_v13  ;;  %955 = vrcp.f32 %v398_v53  ;;  %v447_v13 = vld [vmem:[#allocation2] sm:$0xff] }
  0xc8   : > { %432 = vrot.lane.b32.xlu2 %v1206_v46, %s1075_s19  ;;  %v428_v26 = vmul.f32 %v424_v17, %v1206_v46 }
  0xc9   : > { %489 = vrot.lane.b32.xlu1 %v1208_v49, %s1076_s20  ;;  %463 = vrot.lane.b32.xlu0 %v1208_v49, %s1077_s21  ;;  %v429_v25 = vmul.f32 %v425_v18, %v1208_v49 }
  0xcc   : > { %v954_v54 = vpop.eup %953 }
  0xcd   : > { %v405_v55 = vmul.f32 %v954_v54, %v397_v50  ;;  %v956_v57 = vpop.eup %955 }
  0xce   : > { %v406_v59 = vmul.f32 %v956_v57, %v398_v53 }
  0xcf   : > { %v409_v56 = vsub.f32 2.0, %v405_v55  ;;  %v551_v55 = vld [vmem:[#allocation2 + $0xa0] sm:$0xff] }
  0xd0   : > { %436 = vrot.lane.b32.xlu2 %v1208_v49, %s1075_s19  ;;  %v410_v61 = vsub.f32 2.0, %v406_v59 }
  0xd1   : > { %511 = vrot.lane.b32.xlu1 %v1206_v46, %s1078_s22  ;;  %485 = vrot.lane.b32.xlu0 %v1206_v46, %s1076_s20  ;;  %v413_v58 = vmul.f32 %v954_v54, %v409_v56  ;;  %v552_v56 = vld [vmem:[#allocation2 + $0xa8] sm:$0xff] }
  0xd2   : > { %v414_v63 = vmul.f32 %v956_v57, %v410_v61  ;;  %v577_v61 = vld [vmem:[#allocation2 + $0xc0] sm:$0xff] }
  0xd3   : > { %v417_v60 = vmul.f32 %v413_v58, %v393_v47 }
  0xd4   : > { %v418_v0 = vmul.f32 %v414_v63, %v394_v52  ;;  %v578_v63 = vld [vmem:[#allocation2 + $0xc8] sm:$0xff] }
  0xd5   : > { %v1233_v62 = vmul.f32 %v417_v60, %v1200_v19  ;;  %v473_v19 = vld [vmem:[#allocation2 + $0x20] sm:$0xff] }
  0xd6   : > { %v1241_v1 = vmul.f32 %v418_v0, %v1203_v30  ;;  %v500_v30 = vld [vmem:[#allocation2 + $0x48] sm:$0xff] }
  0xd8   : > { %459 = vrot.lane.b32.xlu2 %v1206_v46, %s1077_s21 }
  0xd9   : > { %567 = vrot.lane.b32.xlu1 %v1208_v49, %s1079_s23  ;;  %541 = vrot.lane.b32.xlu0 %v1208_v49, %s1080_s29 }
  0xe0   : > { %515 = vrot.lane.b32.xlu2 %v1208_v49, %s1078_s22 }
  0xe1   : > { %589 = vrot.lane.b32.xlu1 %v1206_v46, %s1081_s8  ;;  %563 = vrot.lane.b32.xlu0 %v1206_v46, %s1079_s23 }
  0xe8   : > { %537 = vrot.lane.b32.xlu2 %v1206_v46, %s1080_s29 }
  0xe9   : > { %434 = vrot.lane.b32.xlu1 %v1233_v62, %s1075_s19  ;;  %461 = vrot.lane.b32.xlu0 %v1233_v62, %s1077_s21 }
  0xf0   : > { %593 = vrot.lane.b32.xlu2 %v1208_v49, %s1081_s8 }
  0xf1   : > { %438 = vrot.lane.b32.xlu1 %v1241_v1, %s1075_s19  ;;  %517 = vrot.lane.b32.xlu0 %v1241_v1, %s1078_s22 }
  0xf8   : > { %491 = vrot.lane.b32.xlu2 %v1241_v1, %s1076_s20 }
  0xf9   : > { %465 = vrot.lane.b32.xlu1 %v1241_v1, %s1077_s21  ;;  %539 = vrot.lane.b32.xlu0 %v1233_v62, %s1080_s29  ;;  %s286_s21 = sand.u32 1, %s1061_s25  }
 0x100   : > { %513 = vrot.lane.b32.xlu2 %v1233_v62, %s1078_s22  ;;  %s859_s22 = sshll.u32 %s286_s21, 3 }
 0x101   : > { %487 = vrot.lane.b32.xlu1 %v1233_v62, %s1076_s20  ;;  %595 = vrot.lane.b32.xlu0 %v1241_v1, %s1081_s8  ;;  %s288_s13 = scalar_lea.vmem [#allocation5], %s859_s22  ;;  %s1023_s20 = scalar_lea.hbm %s1422_s7, 16 }
 0x102   : > { %s779_s14 = sshll.u32 %s288_s13, 4  ;;  %s780_s14 = int_to_ptr.vmem [resolvable:$true] %s779_s14 }
 0x108   : > { %569 = vrot.lane.b32.xlu2 %v1241_v1, %s1079_s23 }
 0x109   : > { %543 = vrot.lane.b32.xlu1 %v1241_v1, %s1080_s29  ;;  %617 = vrot.lane.b32.xlu0 %v1233_v62, %s1082_s9 }
 0x110   : > { %591 = vrot.lane.b32.xlu2 %v1233_v62, %s1081_s8 }
 0x111   : > { %565 = vrot.lane.b32.xlu1 %v1233_v62, %s1079_s23  ;;  %619 = vrot.lane.b32.xlu0 %v1208_v49, %s1082_s9  ;;  %s876_s23 = sshll.u32 %s1144_s28, 3  ;;  %s766_s28 = scalar_lea.sflag [#allocation4], %s286_s21 }
 0x118   : > { %615 = vrot.lane.b32.xlu2 %v1206_v46, %s1082_s9 }
 0x119   : > { %621 = vrot.lane.b32.xlu1 %v1241_v1, %s1082_s9  ;;  %705 = vperm.xlu0 %938, %v301_v2   ;;  %s777_s9 = scalar_lea.hbm %s1422_s7, %s876_s23 }
 0x11a   : > { %s781_s15 = sshll.u32 %s777_s9, 4  ;;  %s782_s15 = int_to_ptr.hbm [resolvable:$true] %s781_s15 }
 0x11b   : > { %s1017_s16 = sshra.s32 %s782_s15, 4  ;;  %s1018_s16 = int_to_ptr.hbm [resolvable:$true] %s1017_s16 }
 0x11c   : > { %s1019_s17 = scalar_lea.hbm %s1018_s16, 8  ;;  %p1024_p3 = scmp.lt.s32.totalorder %s1018_s16, %s1422_s7 }
 0x11d   : > { %p1020_p0 = scmp.ne.s32.totalorder %s1018_s16, %s1019_s17  ;;  %p1025_p4 = scmp.lt.s32.totalorder %s1023_s20, %s1019_s17 }
 0x11f   : > { %p1021_p1 = pnand %p1020_p0, %p1161_p5  ;;  %p1026_p7 = por %p1025_p4, %p1024_p3 }
 0x120   : > { %643 = vperm.xlu2 %940, %v299_v3  }
 0x121   : > { %648 = vperm.xlu1 %939, %v300_v4   ;;  %p1022_p2 = pneg %p1021_p1 }
 0x122   : > { %v433_v5 = vpop.permute.xlu2 %432 }
 0x123   : > { %p1027_p8 = pnand %p1026_p7, %p1022_p2 }
 0x12a   : > { %v437_v6 = vpop.permute.xlu2 %436 }
 0x12b   : > { %v443_v15 = vsel %vm442_vm2, %v433_v5, %v437_v6  ;;  %v445_v16 = vsel %vm442_vm2, %v437_v6, %v433_v5 }
 0x12c   : > { %v451_v23 = vmul.f32 %v447_v13, %v445_v16  ;;  %v452_v24 = vmul.f32 %v448_v14, %v443_v15 }
 0x12e   : > { %v455_v32 = vadd.f32 %v451_v23, %v428_v26  ;;  %v456_v33 = vadd.f32 %v452_v24, %v429_v25  ;;  %v449_v24 = vld [vmem:[#allocation2 + $0x10] sm:$0xff]  ;;  %v450_v25 = vld [vmem:[#allocation2 + $0x18] sm:$0xff] }
 0x132   : > { %v460_v8 = vpop.permute.xlu2 %459 }
 0x13a   : > { %v516_v10 = vpop.permute.xlu2 %515 }
 0x13b   : > { %v490_v11 = vpop.permute.xlu1 %489  ;;  %v464_v12 = vpop.permute.xlu0 %463 }
 0x13c   : > { %v468_v21 = vsel %vm467_vm3, %v460_v8, %v464_v12  ;;  %v470_v22 = vsel %vm467_vm3, %v464_v12, %v460_v8 }
 0x13d   : > { %v477_v27 = vmul.f32 %v473_v19, %v470_v22  ;;  %v478_v28 = vmul.f32 %v474_v20, %v468_v21 }
 0x13f   : > { %v481_v42 = vadd.f32 %v477_v27, %v455_v32  ;;  %v482_v43 = vadd.f32 %v478_v28, %v456_v33  ;;  %v426_v28 = vld [vmem:[#allocation2 + $0x90] sm:$0xff] }
 0x142   : > { %v538_v31 = vpop.permute.xlu2 %537 }
 0x143   : > { %v512_v34 = vpop.permute.xlu1 %511  ;;  %v486_v35 = vpop.permute.xlu0 %485 }
 0x144   : > { %v520_v38 = vsel %vm519_vm4, %v512_v34, %v516_v10  ;;  %v522_v39 = vsel %vm519_vm4, %v516_v10, %v512_v34  ;;  %v494_v40 = vsel %vm493_vm5, %v486_v35, %v490_v11  ;;  %v496_v41 = vsel %vm493_vm5, %v490_v11, %v486_v35 }
 0x145   : > { %v503_v44 = vmul.f32 %v499_v29, %v496_v41  ;;  %v504_v45 = vmul.f32 %v500_v30, %v494_v40  ;;  %v529_v46 = vmul.f32 %v525_v36, %v522_v39  ;;  %v530_v47 = vmul.f32 %v526_v37, %v520_v38  ;;  %v427_v29 = vld [vmem:[#allocation2 + $0x98] sm:$0xff]  ;;  %v475_v30 = vld [vmem:[#allocation2 + $0x30] sm:$0xff]  ;;  %v603_v36 = vld [vmem:[#allocation2 + $0xe0] sm:$0xff] }
 0x146   : > { %v604_v37 = vld [vmem:[#allocation2 + $0xe8] sm:$0xff] }
 0x147   : > { %v507_v48 = vadd.f32 %v503_v44, %v481_v42  ;;  %v508_v49 = vadd.f32 %v504_v45, %v482_v43  ;;  %v501_v42 = vld [vmem:[#allocation2 + $0x50] sm:$0xff]  ;;  %v502_v43 = vld [vmem:[#allocation2 + $0x58] sm:$0xff] }
 0x149   : > { %v533_v50 = vadd.f32 %v529_v46, %v507_v48  ;;  %v534_v51 = vadd.f32 %v530_v47, %v508_v49  ;;  %v430_v46 = vmul.f32 %v426_v28, %v1233_v62  ;;  %v431_v47 = vmul.f32 %v427_v29, %v1241_v1 }
 0x14a   : > { %v594_v54 = vpop.permute.xlu2 %593 }
 0x14b   : > { %v568_v52 = vpop.permute.xlu1 %567  ;;  %v542_v53 = vpop.permute.xlu0 %541 }
 0x14c   : > { %v546_v57 = vsel %vm545_vm6, %v538_v31, %v542_v53  ;;  %v548_v58 = vsel %vm545_vm6, %v542_v53, %v538_v31  ;;  %v476_v31 = vld [vmem:[#allocation2 + $0x38] sm:$0xff] }
 0x14d   : > { %v555_v59 = vmul.f32 %v551_v55, %v546_v57  ;;  %v556_v60 = vmul.f32 %v552_v56, %v548_v58  ;;  %v527_v57 = vld [vmem:[#allocation2 + $0x70] sm:$0xff] }
 0x14f   : > { %v559_v5 = vadd.f32 %v555_v59, %v533_v50  ;;  %v560_v6 = vadd.f32 %v556_v60, %v534_v51  ;;  %v629_v60 = vld [vmem:[#allocation2 + $0x100] sm:$0xff] }
 0x152   : > { %v492_v10 = vpop.permute.xlu2 %491 }
 0x153   : > { %v590_v0 = vpop.permute.xlu1 %589  ;;  %v564_v2 = vpop.permute.xlu0 %563 }
 0x154   : > { %v572_v3 = vsel %vm571_vm7, %v564_v2, %v568_v52  ;;  %v574_v4 = vsel %vm571_vm7, %v568_v52, %v564_v2  ;;  %v598_v38 = vsel %vm597_vm8, %v590_v0, %v594_v54  ;;  %v600_v39 = vsel %vm597_vm8, %v594_v54, %v590_v0  ;;  %v528_v0 = vld [vmem:[#allocation2 + $0x78] sm:$0xff] }
 0x155   : > { %v581_v7 = vmul.f32 %v577_v61, %v572_v3  ;;  %v582_v8 = vmul.f32 %v578_v63, %v574_v4  ;;  %v607_v51 = vmul.f32 %v603_v36, %v598_v38  ;;  %v608_v52 = vmul.f32 %v604_v37, %v600_v39  ;;  %v630_v61 = vld [vmem:[#allocation2 + $0x108] sm:$0xff]  ;;  %v553_v3 = vld [vmem:[#allocation2 + $0xb0] sm:$0xff]  ;;  %v554_v4 = vld [vmem:[#allocation2 + $0xb8] sm:$0xff] }
 0x156   : > { %v605_v37 = vld [vmem:[#allocation2 + $0xf0] sm:$0xff]  ;;  %v606_v39 = vld [vmem:[#allocation2 + $0xf8] sm:$0xff] }
 0x157   : > { %v585_v11 = vadd.f32 %v581_v7, %v559_v5  ;;  %v586_v12 = vadd.f32 %v582_v8, %v560_v6 }
 0x159   : > { %v612_v63 = vadd.f32 %v608_v52, %v586_v12  ;;  %v611_v62 = vadd.f32 %v607_v51, %v585_v11 }
 0x15a   : > { %v514_v15 = vpop.permute.xlu2 %513 }
 0x15b   : > { %v435_v13 = vpop.permute.xlu1 %434  ;;  %v462_v14 = vpop.permute.xlu0 %461 }
 0x162   : > { %v1311_v18 = vpop.permute.xlu2 %569 }
 0x163   : > { %v439_v16 = vpop.permute.xlu1 %438  ;;  %v518_v17 = vpop.permute.xlu0 %517 }
 0x164   : > { %v444_v26 = vsel %vm442_vm2, %v435_v13, %v439_v16  ;;  %v446_v27 = vsel %vm442_vm2, %v439_v16, %v435_v13  ;;  %v521_v1 = vsel %vm519_vm4, %v514_v15, %v518_v17  ;;  %v523_v2 = vsel %vm519_vm4, %v518_v17, %v514_v15  ;;  %v580_v15 = vld [vmem:[#allocation2 + $0xd8] sm:$0xff] }
 0x165   : > { %v453_v40 = vmul.f32 %v449_v24, %v446_v27  ;;  %v454_v41 = vmul.f32 %v450_v25, %v444_v26  ;;  %v532_v24 = vmul.f32 %v528_v0, %v521_v1 }
 0x167   : > { %v457_v53 = vadd.f32 %v453_v40, %v430_v46  ;;  %v458_v54 = vadd.f32 %v454_v41, %v431_v47 }
 0x16a   : > { %v1315_v23 = vpop.permute.xlu2 %591 }
 0x16b   : > { %v466_v19 = vpop.permute.xlu1 %465  ;;  %v540_v20 = vpop.permute.xlu0 %539 }
 0x16c   : > { %v469_v32 = vsel %vm467_vm3, %v462_v14, %v466_v19  ;;  %v471_v33 = vsel %vm467_vm3, %v466_v19, %v462_v14  ;;  %v579_v14 = vld [vmem:[#allocation2 + $0xd0] sm:$0xff] }
 0x16d   : > { %v479_v48 = vmul.f32 %v475_v30, %v471_v33  ;;  %v480_v49 = vmul.f32 %v476_v31, %v469_v32 }
 0x16f   : > { %v483_v58 = vadd.f32 %v479_v48, %v457_v53  ;;  %v484_v59 = vadd.f32 %v480_v49, %v458_v54 }
 0x172   : > { %v616_v50 = vpop.permute.xlu2 %615 }
 0x173   : > { %v488_v21 = vpop.permute.xlu1 %487  ;;  %v1313_v22 = vpop.permute.xlu0 %595 }
 0x174   : > { %v495_v44 = vsel %vm493_vm5, %v488_v21, %v492_v10  ;;  %v497_v45 = vsel %vm493_vm5, %v492_v10, %v488_v21  ;;  %v531_v21 = vmul.f32 %v527_v57, %v523_v2  ;;  %v599_v40 = vsel %vm597_vm8, %v1315_v23, %v1313_v22 }
 0x175   : > { %v505_v55 = vmul.f32 %v501_v42, %v497_v45  ;;  %v506_v56 = vmul.f32 %v502_v43, %v495_v44  ;;  %v601_v41 = vsel %vm597_vm8, %v1313_v22, %v1315_v23  ;;  %v631_v44 = vld [vmem:[#allocation2 + $0x110] sm:$0xff]  ;;  %v632_v45 = vld [vmem:[#allocation2 + $0x118] sm:$0xff]  ;;  %v609_v22 = vmul.f32 %v605_v37, %v599_v40 }
 0x176   : > { %v610_v23 = vmul.f32 %v606_v39, %v601_v41 }
 0x177   : > { %v509_v10 = vadd.f32 %v505_v55, %v483_v58  ;;  %v510_v12 = vadd.f32 %v506_v56, %v484_v59 }
 0x179   : > { %v535_v30 = vadd.f32 %v531_v21, %v509_v10  ;;  %v536_v31 = vadd.f32 %v532_v24, %v510_v12 }
 0x17a   : > { %v644_v27 = vpop.permute.xlu2 %643 }
 0x17b   : > { %v544_v34 = vpop.permute.xlu1 %543  ;;  %v1326_v35 = vpop.permute.xlu0 %617 }
 0x17c   : > { %v547_v5 = vsel %vm545_vm6, %v540_v20, %v544_v34  ;;  %v549_v6 = vsel %vm545_vm6, %v544_v34, %v540_v20 }
 0x17d   : > { %v557_v25 = vmul.f32 %v553_v3, %v547_v5  ;;  %v558_v26 = vmul.f32 %v554_v4, %v549_v6 }
 0x17f   : > { %v561_v38 = vadd.f32 %v557_v25, %v535_v30 }
 0x183   : > { %v566_v7 = vpop.permute.xlu1 %565  ;;  %v620_v8 = vpop.permute.xlu0 %619 }
 0x184   : > { %v624_v11 = vsel %vm623_vm9, %v616_v50, %v620_v8  ;;  %v626_v13 = vsel %vm623_vm9, %v620_v8, %v616_v50  ;;  %v573_v16 = vsel %vm571_vm7, %v566_v7, %v1311_v18  ;;  %v575_v17 = vsel %vm571_vm7, %v1311_v18, %v566_v7 }
 0x185   : > { %v633_v19 = vmul.f32 %v629_v60, %v624_v11  ;;  %v634_v20 = vmul.f32 %v630_v61, %v626_v13  ;;  %v583_v32 = vmul.f32 %v579_v14, %v573_v16  ;;  %v584_v33 = vmul.f32 %v580_v15, %v575_v17 }
 0x186   : > { %v562_v18 = vadd.f32 %v558_v26, %v536_v31 }
 0x187   : > { %v638_v28 = vadd.f32 %v634_v20, %v612_v63  ;;  %v637_v29 = vadd.f32 %v633_v19, %v611_v62  ;;  %v587_v47 = vadd.f32 %v583_v32, %v561_v38 }
 0x188   : > { %v588_v48 = vadd.f32 %v584_v33, %v562_v18 }
 0x189   : > { %v1357_v34 = vadd.f32 %v644_v27, %v637_v29  ;;  %v1359_v36 = vadd.f32 %v644_v27, %v638_v28  ;;  %v613_v55 = vadd.f32 %v609_v22, %v587_v47 }
 0x18a   : > { %v614_v56 = vadd.f32 %v610_v23, %v588_v48 }
 0x18b   : > { %v655_v42 = vmin.f32 %v1357_v34, 20.0  ;;  %v656_v43 = vmin.f32 %v1359_v36, 20.0  ;;  %v622_v46 = vpop.permute.xlu1 %621  ;;  %v706_v48 = vpop.permute.xlu0 %705 }
 0x18c   : > { %v625_v49 = vsel %vm623_vm9, %v1326_v35, %v622_v46  ;;  %v627_v50 = vsel %vm623_vm9, %v622_v46, %v1326_v35 }
 0x18d   : > { %v659_v51 = vmul.f32 1.442695, %v655_v42  ;;  %v661_v52 = vmul.f32 1.442695, %v656_v43  ;;  %v635_v53 = vmul.f32 %v631_v44, %v625_v49  ;;  %v636_v54 = vmul.f32 %v632_v45, %v627_v50  ;;  %v296_v45 = vld [vmem:[%s1420_s5] sm:$0xf] }
 0x18e   : > { %v754_v50 = vld.sshfl [vmem:[#allocation1 + $0x8] sm:$0xff pattern:$0x75316420] }
 0x18f   : > { %957 = vpow2.f32 %v659_v51  ;;  %v639_v57 = vadd.f32 %v635_v53, %v613_v55  ;;  %v640_v58 = vadd.f32 %v636_v54, %v614_v56 }
 0x190   : > { %959 = vpow2.f32 %v661_v52  ;;  %v753_v52 = vld.sshfl [vmem:[#allocation1] sm:$0xff pattern:$0x75316420] }
 0x193   : > { %v649_v59 = vpop.permute.xlu1 %648 }
 0x194   : > { %v653_v60 = vadd.f32 %v649_v59, %v639_v57  ;;  %v654_v61 = vadd.f32 %v649_v59, %v640_v58 }
 0x195   : > { %v958_v63 = vpop.eup %957 }
 0x196   : > { %v960_v62 = vpop.eup %959  ;;  %v657_v0 = vmin.f32 %v653_v60, 20.0  ;;  %v658_v9 = vmin.f32 %v654_v61, 20.0  ;;  %v667_v35 = vadd.f32 2.0, %v958_v63 }
 0x197   : > { %v668_v1 = vadd.f32 2.0, %v960_v62 }
 0x198   : > { %v663_v2 = vmul.f32 1.442695, %v657_v0  ;;  %v665_v3 = vmul.f32 1.442695, %v658_v9  ;;  %v671_v4 = vmul.f32 %v958_v63, %v667_v35 }
 0x199   : > { %v672_v5 = vmul.f32 %v960_v62, %v668_v1 }
 0x19a   : > { %961 = vpow2.f32 %v663_v2  ;;  %v675_v6 = vadd.f32 2.0, %v671_v4 }
 0x19b   : > { %963 = vpow2.f32 %v665_v3  ;;  %v676_v7 = vadd.f32 2.0, %v672_v5 }
 0x19c   : > { %965 = vrcp.f32 %v675_v6 }
 0x19d   : > { %967 = vrcp.f32 %v676_v7 }
 0x1a0   : > { %v962_v8 = vpop.eup %961 }
 0x1a1   : > { %v964_v10 = vpop.eup %963  ;;  %v669_v12 = vadd.f32 2.0, %v962_v8 }
 0x1a2   : > { %v670_v11 = vadd.f32 2.0, %v964_v10  ;;  %v966_v15 = vpop.eup %965 }
 0x1a3   : > { %v673_v13 = vmul.f32 %v962_v8, %v669_v12  ;;  %v968_v17 = vpop.eup %967  ;;  %v683_v20 = vmul.f32 %v966_v15, %v675_v6 }
 0x1a4   : > { %v674_v14 = vmul.f32 %v964_v10, %v670_v11  ;;  %v684_v21 = vmul.f32 %v968_v17, %v676_v7 }
 0x1a5   : > { %v677_v16 = vadd.f32 2.0, %v673_v13  ;;  %v687_v24 = vsub.f32 2.0, %v683_v20 }
 0x1a6   : > { %v678_v19 = vadd.f32 2.0, %v674_v14  ;;  %v688_v26 = vsub.f32 2.0, %v684_v21 }
 0x1a7   : > { %969 = vrcp.f32 %v677_v16  ;;  %v691_v31 = vmul.f32 %v966_v15, %v687_v24 }
 0x1a8   : > { %971 = vrcp.f32 %v678_v19  ;;  %v692_v33 = vmul.f32 %v968_v17, %v688_v26 }
 0x1a9   : > { %v695_v39 = vmul.f32 %v691_v31, %v671_v4 }
 0x1aa   : > { %v696_v41 = vmul.f32 %v692_v33, %v672_v5 }
 0x1ab   : > { %v699_v44 = vmul.f32 %v695_v39, %v1357_v34 }
 0x1ac   : > { %v700_v46 = vmul.f32 %v696_v41, %v1359_v36 }
 0x1ad   : > { %v970_v25 = vpop.eup %969 }
 0x1ae   : > { %v972_v27 = vpop.eup %971  ;;  %v685_v28 = vmul.f32 %v970_v25, %v677_v16 }
 0x1af   : > { %v686_v29 = vmul.f32 %v972_v27, %v678_v19 }
 0x1b0   : > { %v689_v30 = vsub.f32 2.0, %v685_v28 }
 0x1b1   : > { %v690_v32 = vsub.f32 2.0, %v686_v29 }
 0x1b2   : > { %v693_v37 = vmul.f32 %v970_v25, %v689_v30 }
 0x1b3   : > { %v694_v38 = vmul.f32 %v972_v27, %v690_v32 }
 0x1b4   : > { %v697_v18 = vmul.f32 %v693_v37, %v673_v13 }
 0x1b5   : > { %v698_v40 = vmul.f32 %v694_v38, %v674_v14 }
 0x1b6   : > { %v701_v42 = vmul.f32 %v697_v18, %v653_v60 }
 0x1b7   : > { %v702_v43 = vmul.f32 %v698_v40, %v654_v61 }
 0x1b8   : > { %726 = vmatpush.msra.mxu2 %v701_v42 }
 0x1b9   : > { %746 = vmatpush.msra.mxu3 %v702_v43 }
 0x1ba   : > { %727 = vmatpush.msra.mxu2 %v699_v44 }
 0x1bb   : > { %747 = vmatpush.msra.mxu3 %v700_v46  ;;  %868 = vmatmul.msk.f32.vlgmr.msra.gmra.mxu2 %vm708_vm10, %v296_v45 }
 0x1bc   : > { %869 = vmatmul.msk.f32.vlgmr.msra.gmra.mxu3 %vm708_vm10, %v296_v45 }
 0x23e   : > { %v729_v47 = vpop.f32.mrf.mxu2 }
 0x23f   : > { %v749_v49 = vpop.f32.mrf.mxu3  ;;  %v730_v34 = vadd.f32 %v729_v47, %v706_v48 }
 0x240   : > { %v750_v51 = vadd.f32 %v749_v49, %v706_v48 }
 0x241   : > { %v757_v22 = vadd.f32 %v753_v52, %v730_v34 }
 0x242   : > { %v758_v36 = vadd.f32 %v754_v50, %v750_v51 }
 0x244   : > { %v761_v23 = vrot.slane %v758_v36, 4 }
 0x246   : > { %v762_v53 = vsel %vm324_vm0, %v757_v22, %v761_v23 }
 0x247   : > { %764 = vst [vmem:[%s288_s13] sm:$0xff] %v762_v53 }
 0x248   : > { %1030 = shalt.err (!%p1027_p8)
}
 0x249   : > { %881 = dma.vmem_to_hbm [thread:$0]  (%p1161_p5), %s780_s14, 128, %s782_s15, %s766_s28  }
 0x24a PF: > { %p893_p9 = scmp.ge.s32.totalorder %s1069_s27, 2  ;;  %s793_s21 = sand.u32 1, %s1057_s24  }
 0x24b   : > { %s794_s29 = scalar_lea.sflag [#allocation4], %s793_s21 }
 0x24c   : > { %p888_p10 = pnand %p893_p9, %p1165_p6 }
 0x24e   : > { %p889_p11 = pneg %p888_p10 }
 0x250   : > { %1052 = dma.done.wait (%p889_p11), %s794_s29, 128  }
 0x251   : > { %1054 = vsyncadd (%p889_p11), %s794_s29, 4294967168  ;;  %p18_p12 = scmp.ge.s32.totalorder %s1148_s30, 4   ;;  %s1425_s24 = smov %s1061_s25 }
 0x252   : > { %s1426_s25 = smov %s1065_s26  ;;  %s1427_s26 = smov %s1159_s10 }
 0x253   : > { %s1428_s27 = smov %s1148_s30  ;;  %20 = sbr.rel (!%p18_p12) target bundleno = 4 (0x4), region = 96 }
 0x258   :  { %800 = vsyncpa [#allocation3], 1 }
 0x259   :  { %802 = vsyncpa [#allocation3 + $0x1], 1 }
 0x25a   :  { %803 = vsyncpa [#allocation4], 1 }
 0x25b   :  { %805 = vsyncpa [#allocation4 + $0x1], 1 }

</bundles_post_ra>
